<compile_context>
chip_gen: v7x
topology: tpu7x:2x2x1
jax: 0.10.0
libtpu: 0.0.40
codegen_flags: <defaults>
</compile_context>

<pallas_src>
import functools

import jax
import jax.numpy as jnp
from jax.experimental import pallas as pl
from jax.experimental.pallas import tpu as pltpu

# LossConfig lambdas (from the PyTorch module)
LAMBDA_EPE = 0.1
LAMBDA_WARP = 0.01
LAMBDA_GAN = 0.1

# Max lanes per pixel tile (multiple of 128). f32 worst case per grid step:
# (2*C + 2*Cw) * 4B * 32768 ~ 1.3 MB of streamed data -> ~2.6 MB of
# double-buffered input VMEM + ~2 MB of accumulators: safe on v5e/v6e/v7x.
_MAX_TILE_PIX = 32768


def _mixed_gen_loss_kernel(pred_ref, targ_ref, warp_ref, orig_ref,
                           preal_ref, real_ref, out_ref,
                           acc_epe, acc_warp, *,
                           hw, tile_pix, n_pix, n_warp, n_gan):
    n = pl.program_id(0)
    t = pl.program_id(1)
    is_first = jnp.logical_and(n == 0, t == 0)
    is_last = jnp.logical_and(n == pl.num_programs(0) - 1,
                              t == pl.num_programs(1) - 1)

    @pl.when(is_first)
    def _init():
        acc_epe[...] = jnp.zeros_like(acc_epe)
        acc_warp[...] = jnp.zeros_like(acc_warp)

    # Lane-validity mask for a (possibly partial) last pixel tile.
    lane = jax.lax.broadcasted_iota(jnp.int32, (1, tile_pix), 1)
    valid = (t * tile_pix + lane) < hw                          # (1, T)

    # ---- EPE: per-pixel sqrt(sum_c (p - t)^2), accumulated per-lane (VPU) ----
    d = pred_ref[...].astype(jnp.float32) - targ_ref[...].astype(jnp.float32)
    sq = jnp.sum(d * d, axis=1)                                 # (1, T) channel reduce
    acc_epe[...] += jnp.where(valid, jnp.sqrt(sq), 0.0)

    # ---- Warp L1: elementwise |pw - o| accumulation, no per-tile XLU reduce ----
    ad = jnp.abs(warp_ref[...].astype(jnp.float32)
                 - orig_ref[...].astype(jnp.float32))           # (1, Cw, T)
    acc_warp[...] += jnp.where(valid[:, None, :], ad, 0.0)

    # ---- Epilogue: single cross-lane reduce per loss + tiny BCE, once ----
    @pl.when(is_last)
    def _finalize():
        loss_epe = jnp.sum(acc_epe[...]) * (1.0 / n_pix)
        loss_warp = jnp.sum(acc_warp[...]) * (1.0 / n_warp)

        # BCELoss(predicted_real, real), mean reduction, log clamped at -100.
        p = preal_ref[...].astype(jnp.float32)
        r = real_ref[...].astype(jnp.float32)
        log_p = jnp.maximum(jnp.log(p), -100.0)
        log_1mp = jnp.maximum(jnp.log(1.0 - p), -100.0)
        loss_gan = jnp.sum(-(r * log_p + (1.0 - r) * log_1mp)) * (1.0 / n_gan)

        total = (LAMBDA_EPE * loss_epe + LAMBDA_WARP * loss_warp
                 + LAMBDA_GAN * loss_gan)
        out_ref[0] = total
        out_ref[1] = loss_epe
        out_ref[2] = loss_warp
        out_ref[3] = loss_gan


def mixed_gen_loss(prediction, targets, predicted_warp, original,
                   predicted_real, real):
    """Returns (total_loss, dict(loss_epe, loss_warp, loss_gan))."""
    n, c, h, w = prediction.shape
    nw, cw, hh, ww = predicted_warp.shape
    # The unified pixel-tile grid assumes flow/warp tensors share (N, H, W),
    # which is what the flow-warping setup implies.
    assert (nw, hh, ww) == (n, h, w), "prediction/predicted_warp must share N,H,W"
    hw = h * w

    # Free, contiguous reshapes only — no HBM transpose, no dtype upcast.
    pred3d = prediction.reshape(n, c, hw)
    targ3d = targets.reshape(n, c, hw)
    warp3d = predicted_warp.reshape(n, cw, hw)
    orig3d = original.reshape(n, cw, hw)
    preal2d = predicted_real.reshape(predicted_real.shape[0], -1)
    real2d = real.reshape(real.shape[0], -1)
    b, k = preal2d.shape

    # Pixel tile: full H*W if it fits, else a 128-multiple cap (masked last tile).
    tile_pix = hw if hw <= _MAX_TILE_PIX else _MAX_TILE_PIX
    num_pt = pl.cdiv(hw, tile_pix)
    grid = (n, num_pt)

    kern = functools.partial(
        _mixed_gen_loss_kernel,
        hw=hw, tile_pix=tile_pix,
        n_pix=float(n * hw),            # EPE mean divisor: N*H*W pixels
        n_warp=float(n * cw * hw),      # warp mean divisor: N*Cw*H*W elements
        n_gan=float(b * k))             # BCE mean divisor

    # Explicit VMEM budget: double-buffered input tiles + (sublane-padded)
    # accumulators, with headroom; floor/ceiling keep it safe on v5e/v6e/v7x.
    in_bytes = prediction.dtype.itemsize
    vmem_est = 2 * in_bytes * tile_pix * (2 * c + 2 * cw)   # pipelined input bufs
    vmem_est += 4 * tile_pix * 16                           # padded f32 accumulators
    vmem_limit = int(min(max(4 * vmem_est, 16 * 1024 * 1024), 40 * 1024 * 1024))

    out = pl.pallas_call(
        kern,
        out_shape=jax.ShapeDtypeStruct((4,), jnp.float32),
        grid_spec=pltpu.PrefetchScalarGridSpec(
            num_scalar_prefetch=0,
            grid=grid,
            in_specs=[
                pl.BlockSpec((1, c, tile_pix), lambda i, t: (i, 0, t)),
                pl.BlockSpec((1, c, tile_pix), lambda i, t: (i, 0, t)),
                pl.BlockSpec((1, cw, tile_pix), lambda i, t: (i, 0, t)),
                pl.BlockSpec((1, cw, tile_pix), lambda i, t: (i, 0, t)),
                # tiny GAN inputs: resident full-array blocks (fetched once)
                pl.BlockSpec((b, k), lambda i, t: (0, 0)),
                pl.BlockSpec((b, k), lambda i, t: (0, 0)),
            ],
            out_specs=pl.BlockSpec((4,), lambda i, t: (0,),
                                   memory_space=pltpu.MemorySpace.SMEM),
            scratch_shapes=[
                pltpu.VMEM((1, tile_pix), jnp.float32),        # EPE per-lane sums
                pltpu.VMEM((1, cw, tile_pix), jnp.float32),    # warp per-lane sums
            ],
        ),
        compiler_params=pltpu.CompilerParams(
            # Both grid axes carry the running accumulators -> sequential.
            # TODO(synk): per-core partial sums for v7x 2-TC sharding.
            dimension_semantics=("arbitrary", "arbitrary"),
            vmem_limit_bytes=vmem_limit,
        ),
    )(pred3d, targ3d, warp3d, orig3d, preal2d, real2d)

    total = out[0]
    loss_data = {
        "loss_epe": out[1],
        "loss_warp": out[2],
        "loss_gan": out[3],
    }
    return total, loss_data


def _reference(prediction, targets, predicted_warp, original,
               predicted_real, real):
    loss_epe = jnp.mean(jnp.sqrt(jnp.sum((prediction - targets) ** 2, axis=1)))
    loss_warp = jnp.mean(jnp.abs(predicted_warp - original))
    p = predicted_real
    log_p = jnp.maximum(jnp.log(p), -100.0)
    log_1mp = jnp.maximum(jnp.log(1.0 - p), -100.0)
    loss_gan = jnp.mean(-(real * log_p + (1.0 - real) * log_1mp))
    total = LAMBDA_EPE * loss_epe + LAMBDA_WARP * loss_warp + LAMBDA_GAN * loss_gan
    return total, loss_epe, loss_warp, loss_gan


if __name__ == "__main__":
    key = jax.random.PRNGKey(0)
    k1, k2, k3, k4, k5, k6 = jax.random.split(key, 6)

    # flow-like prediction/targets: (N, C=2, H, W)
    prediction = jax.random.normal(k1, (2, 2, 16, 16), dtype=jnp.float32)
    targets = jax.random.normal(k2, (2, 2, 16, 16), dtype=jnp.float32)

    # warped image vs original: (N, 3, H, W)
    predicted_warp = jax.random.normal(k3, (2, 3, 16, 16), dtype=jnp.float32)
    original = jax.random.normal(k4, (2, 3, 16, 16), dtype=jnp.float32)

    # discriminator outputs (probabilities in (0,1)) and real labels
    predicted_real = jax.nn.sigmoid(jax.random.normal(k5, (2, 1), dtype=jnp.float32))
    real = (jax.random.uniform(k6, (2, 1)) > 0.5).astype(jnp.float32)

    total, loss_data = mixed_gen_loss(prediction, targets, predicted_warp,
                                      original, predicted_real, real)
    total = jax.block_until_ready(total)

    ref_total, ref_epe, ref_warp, ref_gan = _reference(
        prediction, targets, predicted_warp, original, predicted_real, real)

    assert jnp.allclose(total, ref_total, rtol=1e-5, atol=1e-5), (total, ref_total)
    assert jnp.allclose(loss_data["loss_epe"], ref_epe, rtol=1e-5, atol=1e-5)
    assert jnp.allclose(loss_data["loss_warp"], ref_warp, rtol=1e-5, atol=1e-5)
    assert jnp.allclose(loss_data["loss_gan"], ref_gan, rtol=1e-5, atol=1e-5)

    print("KERNEL_OK")
</pallas_src>

<mosaic_0001>
module attributes {stable_mosaic.version = 11 : i64} {
  func.func @_mixed_gen_loss_kernel(%arg0: i32, %arg1: i32, %arg2: memref<1x2x256xf32, #tpu.memory_space<vmem>>, %arg3: memref<1x2x256xf32, #tpu.memory_space<vmem>>, %arg4: memref<1x3x256xf32, #tpu.memory_space<vmem>>, %arg5: memref<1x3x256xf32, #tpu.memory_space<vmem>>, %arg6: memref<2x1xf32, #tpu.memory_space<vmem>>, %arg7: memref<2x1xf32, #tpu.memory_space<vmem>>, %arg8: memref<4xf32, #tpu.memory_space<smem>>, %arg9: memref<1x256xf32, #tpu.memory_space<vmem>>, %arg10: memref<1x3x256xf32, #tpu.memory_space<vmem>>) attributes {dimension_semantics = [#tpu.dimension_semantics<arbitrary>, #tpu.dimension_semantics<arbitrary>], iteration_bounds = array<i64: 2, 1>, scalar_prefetch = 0 : i64, scratch_operands = 2 : i64, tpu.core_type = #tpu.core_type<tc>, window_params = [{transform_indices = @transform_0, window_bounds = array<i64: 1, 2, 256>}, {transform_indices = @transform_1, window_bounds = array<i64: 1, 2, 256>}, {transform_indices = @transform_2, window_bounds = array<i64: 1, 3, 256>}, {transform_indices = @transform_3, window_bounds = array<i64: 1, 3, 256>}, {pipeline_mode = #tpu.pipeline_mode<synchronous>, transform_indices = @transform_4, window_bounds = array<i64: 2, 1>}, {pipeline_mode = #tpu.pipeline_mode<synchronous>, transform_indices = @transform_5, window_bounds = array<i64: 2, 1>}, {transform_indices = @transform_6, window_bounds = array<i64: 4>}]} {
    %c0_i32 = arith.constant 0 : i32
    %0 = arith.cmpi eq, %arg0, %c0_i32 : i32
    %c0_i32_0 = arith.constant 0 : i32
    %1 = arith.cmpi eq, %arg1, %c0_i32_0 : i32
    %2 = arith.andi %0, %1 : i1
    %c1_i32 = arith.constant 1 : i32
    %3 = arith.cmpi eq, %arg0, %c1_i32 : i32
    %c0_i32_1 = arith.constant 0 : i32
    %4 = arith.cmpi eq, %arg1, %c0_i32_1 : i32
    %5 = arith.andi %3, %4 : i1
    %6 = arith.extui %2 : i1 to i32
    %c0_i32_2 = arith.constant 0 : i32
    %7 = arith.cmpi ne, %6, %c0_i32_2 : i32
    scf.if %7 {
      %cst_28 = arith.constant 0.000000e+00 : f32
      %39 = vector.broadcast %cst_28 : f32 to vector<1x256xf32>
      %c0_29 = arith.constant 0 : index
      %c0_30 = arith.constant 0 : index
      %40 = vector.load %arg9[%c0_29, %c0_30] : memref<1x256xf32, #tpu.memory_space<vmem>>, vector<1x256xf32>
      tpu.vector_store %arg9[%c0_29, %c0_30], %39 {strides = array<i32>} : memref<1x256xf32, #tpu.memory_space<vmem>>, vector<1x256xf32>,
      %cst_31 = arith.constant 0.000000e+00 : f32
      %41 = vector.broadcast %cst_31 : f32 to vector<1x3x256xf32>
      %c0_32 = arith.constant 0 : index
      %c0_33 = arith.constant 0 : index
      %c0_34 = arith.constant 0 : index
      %42 = vector.load %arg10[%c0_32, %c0_33, %c0_34] : memref<1x3x256xf32, #tpu.memory_space<vmem>>, vector<1x3x256xf32>
      tpu.vector_store %arg10[%c0_32, %c0_33, %c0_34], %41 {strides = array<i32>} : memref<1x3x256xf32, #tpu.memory_space<vmem>>, vector<1x3x256xf32>,
    } else {
    }
    %8 = tpu.iota {dimensions = array<i32: 1>} : vector<1x256xi32>
    %c256_i32 = arith.constant 256 : i32
    %9 = arith.muli %arg1, %c256_i32 : i32
    %10 = vector.broadcast %9 : i32 to vector<1x256xi32>
    %11 = arith.addi %10, %8 : vector<1x256xi32>
    %c256_i32_3 = arith.constant 256 : i32
    %12 = vector.broadcast %c256_i32_3 : i32 to vector<1x256xi32>
    %13 = arith.cmpi slt, %11, %12 : vector<1x256xi32>
    %c0 = arith.constant 0 : index
    %c0_4 = arith.constant 0 : index
    %c0_5 = arith.constant 0 : index
    %14 = vector.load %arg2[%c0, %c0_4, %c0_5] : memref<1x2x256xf32, #tpu.memory_space<vmem>>, vector<1x2x256xf32>
    %c0_6 = arith.constant 0 : index
    %c0_7 = arith.constant 0 : index
    %c0_8 = arith.constant 0 : index
    %15 = vector.load %arg3[%c0_6, %c0_7, %c0_8] : memref<1x2x256xf32, #tpu.memory_space<vmem>>, vector<1x2x256xf32>
    %16 = arith.subf %14, %15 : vector<1x2x256xf32>
    %17 = arith.mulf %16, %16 : vector<1x2x256xf32>
    %cst = arith.constant dense<0.000000e+00> : vector<1x256xf32>
    %18 = vector.multi_reduction <add>, %17, %cst [1] : vector<1x2x256xf32> to vector<1x256xf32>
    %c0_9 = arith.constant 0 : index
    %c0_10 = arith.constant 0 : index
    %19 = vector.load %arg9[%c0_9, %c0_10] : memref<1x256xf32, #tpu.memory_space<vmem>>, vector<1x256xf32>
    %20 = math.sqrt %18 : vector<1x256xf32>
    %cst_11 = arith.constant 0.000000e+00 : f32
    %21 = vector.broadcast %cst_11 : f32 to vector<1x256xf32>
    %22 = arith.select %13, %20, %21 : vector<1x256xi1>, vector<1x256xf32>
    %23 = arith.addf %19, %22 : vector<1x256xf32>
    %c0_12 = arith.constant 0 : index
    %c0_13 = arith.constant 0 : index
    %24 = vector.load %arg9[%c0_12, %c0_13] : memref<1x256xf32, #tpu.memory_space<vmem>>, vector<1x256xf32>
    tpu.vector_store %arg9[%c0_12, %c0_13], %23 {strides = array<i32>} : memref<1x256xf32, #tpu.memory_space<vmem>>, vector<1x256xf32>,
    %c0_14 = arith.constant 0 : index
    %c0_15 = arith.constant 0 : index
    %c0_16 = arith.constant 0 : index
    %25 = vector.load %arg4[%c0_14, %c0_15, %c0_16] : memref<1x3x256xf32, #tpu.memory_space<vmem>>, vector<1x3x256xf32>
    %c0_17 = arith.constant 0 : index
    %c0_18 = arith.constant 0 : index
    %c0_19 = arith.constant 0 : index
    %26 = vector.load %arg5[%c0_17, %c0_18, %c0_19] : memref<1x3x256xf32, #tpu.memory_space<vmem>>, vector<1x3x256xf32>
    %27 = arith.subf %25, %26 : vector<1x3x256xf32>
    %28 = math.absf %27 : vector<1x3x256xf32>
    %c0_20 = arith.constant 0 : index
    %c0_21 = arith.constant 0 : index
    %c0_22 = arith.constant 0 : index
    %29 = vector.load %arg10[%c0_20, %c0_21, %c0_22] : memref<1x3x256xf32, #tpu.memory_space<vmem>>, vector<1x3x256xf32>
    %30 = vector.shape_cast %13 : vector<1x256xi1> to vector<1x1x256xi1>
    %cst_23 = arith.constant 0.000000e+00 : f32
    %31 = vector.shape_cast %30 : vector<1x1x256xi1> to vector<1x1x256xi1>
    %32 = vector.broadcast %31 : vector<1x1x256xi1> to vector<1x3x256xi1>
    %33 = vector.broadcast %cst_23 : f32 to vector<1x3x256xf32>
    %34 = arith.select %32, %28, %33 : vector<1x3x256xi1>, vector<1x3x256xf32>
    %35 = arith.addf %29, %34 : vector<1x3x256xf32>
    %c0_24 = arith.constant 0 : index
    %c0_25 = arith.constant 0 : index
    %c0_26 = arith.constant 0 : index
    %36 = vector.load %arg10[%c0_24, %c0_25, %c0_26] : memref<1x3x256xf32, #tpu.memory_space<vmem>>, vector<1x3x256xf32>
    tpu.vector_store %arg10[%c0_24, %c0_25, %c0_26], %35 {strides = array<i32>} : memref<1x3x256xf32, #tpu.memory_space<vmem>>, vector<1x3x256xf32>,
    %37 = arith.extui %5 : i1 to i32
    %c0_i32_27 = arith.constant 0 : i32
    %38 = arith.cmpi ne, %37, %c0_i32_27 : i32
    scf.if %38 {
      %c0_28 = arith.constant 0 : index
      %c0_29 = arith.constant 0 : index
      %39 = vector.load %arg9[%c0_28, %c0_29] : memref<1x256xf32, #tpu.memory_space<vmem>>, vector<1x256xf32>
      %40 = vector.shape_cast %39 : vector<1x256xf32> to vector<1x1x256xf32>
      %cst_30 = arith.constant dense<0.000000e+00> : vector<1xf32>
      %41 = vector.multi_reduction <add>, %40, %cst_30 [1, 2] : vector<1x1x256xf32> to vector<1xf32>
      %42 = vector.shape_cast %41 : vector<1xf32> to vector<1x1x1xf32>
      %43 = vector.extract %42[0, 0, 0] : f32 from vector<1x1x1xf32>
      %cst_31 = arith.constant 0.001953125 : f32
      %44 = arith.mulf %43, %cst_31 : f32
      %c0_32 = arith.constant 0 : index
      %c0_33 = arith.constant 0 : index
      %c0_34 = arith.constant 0 : index
      %45 = vector.load %arg10[%c0_32, %c0_33, %c0_34] : memref<1x3x256xf32, #tpu.memory_space<vmem>>, vector<1x3x256xf32>
      %46 = vector.shape_cast %45 : vector<1x3x256xf32> to vector<1x1x3x256xf32>
      %cst_35 = arith.constant dense<0.000000e+00> : vector<1xf32>
      %47 = vector.multi_reduction <add>, %46, %cst_35 [1, 2, 3] : vector<1x1x3x256xf32> to vector<1xf32>
      %48 = vector.shape_cast %47 : vector<1xf32> to vector<1x1x1x1xf32>
      %49 = vector.extract %48[0, 0, 0, 0] : f32 from vector<1x1x1x1xf32>
      %cst_36 = arith.constant 6.51041686E-4 : f32
      %50 = arith.mulf %49, %cst_36 : f32
      %c0_37 = arith.constant 0 : index
      %c0_38 = arith.constant 0 : index
      %51 = vector.load %arg6[%c0_37, %c0_38] : memref<2x1xf32, #tpu.memory_space<vmem>>, vector<2x1xf32>
      %c0_39 = arith.constant 0 : index
      %c0_40 = arith.constant 0 : index
      %52 = vector.load %arg7[%c0_39, %c0_40] : memref<2x1xf32, #tpu.memory_space<vmem>>, vector<2x1xf32>
      %53 = math.log %51 : vector<2x1xf32>
      %cst_41 = arith.constant -1.000000e+02 : f32
      %54 = vector.broadcast %cst_41 : f32 to vector<2x1xf32>
      %55 = arith.maximumf %53, %54 : vector<2x1xf32>
      %cst_42 = arith.constant 1.000000e+00 : f32
      %56 = vector.broadcast %cst_42 : f32 to vector<2x1xf32>
      %57 = arith.subf %56, %51 : vector<2x1xf32>
      %58 = math.log %57 : vector<2x1xf32>
      %cst_43 = arith.constant -1.000000e+02 : f32
      %59 = vector.broadcast %cst_43 : f32 to vector<2x1xf32>
      %60 = arith.maximumf %58, %59 : vector<2x1xf32>
      %61 = arith.mulf %52, %55 : vector<2x1xf32>
      %cst_44 = arith.constant 1.000000e+00 : f32
      %62 = vector.broadcast %cst_44 : f32 to vector<2x1xf32>
      %63 = arith.subf %62, %52 : vector<2x1xf32>
      %64 = arith.mulf %63, %60 : vector<2x1xf32>
      %65 = arith.addf %61, %64 : vector<2x1xf32>
      %cst_45 = arith.constant 0.000000e+00 : f32
      %66 = vector.broadcast %cst_45 : f32 to vector<2x1xf32>
      %67 = arith.subf %66, %65 : vector<2x1xf32>
      %68 = vector.shape_cast %67 : vector<2x1xf32> to vector<1x2x1xf32>
      %cst_46 = arith.constant dense<0.000000e+00> : vector<1xf32>
      %69 = vector.multi_reduction <add>, %68, %cst_46 [1, 2] : vector<1x2x1xf32> to vector<1xf32>
      %70 = vector.shape_cast %69 : vector<1xf32> to vector<1x1x1xf32>
      %71 = vector.extract %70[0, 0, 0] : f32 from vector<1x1x1xf32>
      %cst_47 = arith.constant 5.000000e-01 : f32
      %72 = arith.mulf %71, %cst_47 : f32
      %cst_48 = arith.constant 1.000000e-01 : f32
      %73 = arith.mulf %cst_48, %44 : f32
      %cst_49 = arith.constant 0.00999999977 : f32
      %74 = arith.mulf %cst_49, %50 : f32
      %75 = arith.addf %73, %74 : f32
      %cst_50 = arith.constant 1.000000e-01 : f32
      %76 = arith.mulf %cst_50, %72 : f32
      %77 = arith.addf %75, %76 : f32
      %c0_51 = arith.constant 0 : index
      %78 = memref.load %arg8[%c0_51] : memref<4xf32, #tpu.memory_space<smem>>
      memref.store %77, %arg8[%c0_51] : memref<4xf32, #tpu.memory_space<smem>>
      %c1 = arith.constant 1 : index
      %79 = memref.load %arg8[%c1] : memref<4xf32, #tpu.memory_space<smem>>
      memref.store %44, %arg8[%c1] : memref<4xf32, #tpu.memory_space<smem>>
      %c2 = arith.constant 2 : index
      %80 = memref.load %arg8[%c2] : memref<4xf32, #tpu.memory_space<smem>>
      memref.store %50, %arg8[%c2] : memref<4xf32, #tpu.memory_space<smem>>
      %c3 = arith.constant 3 : index
      %81 = memref.load %arg8[%c3] : memref<4xf32, #tpu.memory_space<smem>>
      memref.store %72, %arg8[%c3] : memref<4xf32, #tpu.memory_space<smem>>
    } else {
    }
    return
  }
  func.func @transform_0(%arg0: i32, %arg1: i32) -> (i32, i32, i32) {
    %c0_i32 = arith.constant 0 : i32
    %c0_i32_0 = arith.constant 0 : i32
    return %arg0, %c0_i32, %arg1 : i32, i32, i32
  }
  func.func @transform_1(%arg0: i32, %arg1: i32) -> (i32, i32, i32) {
    %c0_i32 = arith.constant 0 : i32
    %c0_i32_0 = arith.constant 0 : i32
    return %arg0, %c0_i32, %arg1 : i32, i32, i32
  }
  func.func @transform_2(%arg0: i32, %arg1: i32) -> (i32, i32, i32) {
    %c0_i32 = arith.constant 0 : i32
    %c0_i32_0 = arith.constant 0 : i32
    return %arg0, %c0_i32, %arg1 : i32, i32, i32
  }
  func.func @transform_3(%arg0: i32, %arg1: i32) -> (i32, i32, i32) {
    %c0_i32 = arith.constant 0 : i32
    %c0_i32_0 = arith.constant 0 : i32
    return %arg0, %c0_i32, %arg1 : i32, i32, i32
  }
  func.func @transform_4(%arg0: i32, %arg1: i32) -> (i32, i32) {
    %c0_i32 = arith.constant 0 : i32
    %c0_i32_0 = arith.constant 0 : i32
    %c0_i32_1 = arith.constant 0 : i32
    return %c0_i32, %c0_i32_0 : i32, i32
  }
  func.func @transform_5(%arg0: i32, %arg1: i32) -> (i32, i32) {
    %c0_i32 = arith.constant 0 : i32
    %c0_i32_0 = arith.constant 0 : i32
    %c0_i32_1 = arith.constant 0 : i32
    return %c0_i32, %c0_i32_0 : i32, i32
  }
  func.func @transform_6(%arg0: i32, %arg1: i32) -> i32 {
    %c0_i32 = arith.constant 0 : i32
    %c0_i32_0 = arith.constant 0 : i32
    return %c0_i32 : i32
  }
}

</mosaic_0001>

<bundles_post_ra>
// kernel: tpu_custom_call.1
= control target key start
LH: loop header
LB: loop body
LE: loop exit
PB: predicated region body
PF: predicated region fallthrough
CT: control target
= control target key end

     0   :  { %11 = vsyncpa [#allocation5], 0  ;;  %s840_s21 = smov 0   ;;  %s842_s22 = smov 0   ;;  %s914_s0 = inlined_call_operand.vmem [shape: f32[2,2,256], index: 0, kind: input, shape index: {}]   ;;  %s915_s1 = inlined_call_operand.vmem [shape: f32[2,2,256], index: 1, kind: input, shape index: {}]   ;;  %s916_s2 = inlined_call_operand.vmem [shape: f32[2,3,256], index: 2, kind: input, shape index: {}]   ;;  %s917_s3 = inlined_call_operand.vmem [shape: f32[2,3,256], index: 3, kind: input, shape index: {}]   ;;  %s918_s4 = inlined_call_operand.vmem [shape: f32[2,1], index: 4, kind: input, shape index: {}]   ;;  %s919_s5 = inlined_call_operand.vmem [shape: f32[2,1], index: 5, kind: input, shape index: {}]   ;;  %s920_s6 = inlined_call_operand.hbm [shape: f32[4], index: 6, kind: output, shape index: {}]  }
   0x1   :  { %s844_s23 = smov 0  }
   0x2 LB: > { %s688_s24 = sadd.s32 4294967295, %s799_s23   ;;  %s29_s25 = sadd.s32 1, %s795_s22  ;;  %s799_s23 = sphi %s844_s23, %s17_s23   ;;  %s795_s22 = sphi %s842_s22, %s922_s22   ;;  %s791_s21 = sphi %s840_s21, %s921_s21  }
   0x3   : > { %p31_p0 = scmp.ge.s32.totalorder %s29_s25, 2  ;;  %p691_p1 = scmp.ge.s32.totalorder %s799_s23, 1 }
   0x4   : > { %p278_p2 = scmp.lt.s32.totalorder %s799_s23, 3 }
   0x5   : > { %s924_s25 = smov (%p31_p0, %s29_s25), 0 }
   0x6   : > { %p279_p3 = pnand %p691_p1, %p278_p2 }
   0x7   : > { %p335_p4 = scmp.lt.s32.totalorder (!%p279_p3), %s791_s21, 1  ;;  %p374_p5 = scmp.eq.s32.totalorder (!%p279_p3), %s791_s21, 0 }
   0x8   : > { %282 = sbr.rel (%p279_p3) target bundleno = 315 (0x13b), region = 44  ;;  %p378_p6 = scmp.eq.s32.totalorder (!%p279_p3), %s791_s21, 1 }
   0xf   : > { %s336_s26 = scalar_select %p335_p4, %s791_s21, 1 }
  0x10   : > { %382 = sbr.rel (!%p374_p5) target bundleno = 23 (0x17), region = 48  ;;  %v383_v0 = vlaneseq (%p374_p5)  ;;  %v801_v1 = vmov (%p374_p5), 0.0  }
  0x11   : > { %s706_s27 = sshll.u32 %s336_s26, 2  ;;  %s708_s28 = sshll.u32 %s336_s26, 3  ;;  %388 = vst [vmem:[#allocation3] sm:$0x77] (%p374_p5), %v801_v1 }
  0x12   : > { %s342_s7 = scalar_lea.vmem %s914_s0, %s706_s27  ;;  %s352_s10 = scalar_lea.vmem %s915_s1, %s706_s27  ;;  %vm385_vm0 = vcmp.lt.s32.totalorder (%p374_p5), %v383_v0, 256 }
  0x13   : > { %s362_s13 = scalar_lea.vmem %s916_s2, %s708_s28  ;;  %s372_s16 = scalar_lea.vmem %s917_s3, %s708_s28  ;;  %387 = vst.msk [vmem:[#allocation2] sm:$0x3] (%p374_p5), %vm385_vm0, %v801_v1 }
  0x17 PF: > { %v398_v2 = vld [vmem:[%s342_s7] sm:$0xf]  ;;  %v406_v4 = vlaneseq  ;;  %v802_v6 = vmov 1983009808   ;;  %vm413_vm1 = vcmask 1041408   ;;  %vm503_vm7 = vcmask (%p378_p6), 1040384  }
  0x18   : > { %v399_v3 = vld [vmem:[%s352_s10] sm:$0xf]  ;;  %v404_v7 = vunpack.c.l.s4 %v802_v6  ;;  %v803_v36 = vmov 1966171168   ;;  %vm521_vm8 = vcmask (%p378_p6), 1042432   ;;  %vm549_vm9 = vcmask (%p378_p6), 1024  }
  0x19   : > { %v400_v5 = vsub.f32 %v398_v2, %v399_v3  ;;  %v877_v8 = vshrl.u32 %v406_v4, 7  ;;  %v469_v9 = vld [vmem:[%s362_s13] sm:$0x77]  ;;  %v449_v37 = vunpack.c.l.s4 %v803_v36  ;;  %vm466_vm6 = vcmp.lt.s32.totalorder %v406_v4, 256 }
  0x1a   : > { %v470_v10 = vld [vmem:[%s372_s16] sm:$0x77]  ;;  %v405_v12 = vunpack.c.0.s8 %v404_v7 }
  0x1b   : > { %v401_v11 = vmul.f32 %v400_v5, %v400_v5  ;;  %v471_v13 = vsub.f32 %v469_v9, %v470_v10  ;;  %v473_v18 = vld [vmem:[#allocation3] sm:$0x77]  ;;  %v450_v41 = vunpack.c.0.s8 %v449_v37  ;;  %v428_v52 = vld [vmem:[#allocation2] sm:$0x3]  ;;  %v495_v56 = vsub.s32 (%p378_p6), 0, %v877_v8 }
  0x1c   : > { %v408_v14 = vsub.s32 %v405_v12, %v877_v8  ;;  %v499_v57 = vsub.s32 (%p378_p6), 1, %v877_v8  ;;  %v535_v59 = vld [vmem:[%s918_s4] sm:$0x3] (%p378_p6) }
  0x1d   : > { %v472_v15 = vand.u32 2147483647, %v471_v13  ;;  %v453_v48 = vsub.s32 %v450_v41, %v877_v8  ;;  %v540_v63 = vsub.f32 (%p378_p6), 1.0, %v535_v59  ;;  %v536_v7 = vld [vmem:[%s919_s5] sm:$0x3] (%p378_p6) }
  0x1e   : > { %v409_v16 = vrot.slane %v401_v11, %v408_v14  ;;  %v545_v12 = vsub.f32 (%p378_p6), 1.0, %v536_v7 }
  0x1f   : > { %v479_v17 = vcombine.high %v472_v15, %v472_v15 }
  0x20   : > { %v410_v19 = vcombine.high %v409_v16, %v409_v16  ;;  %v414_v20 = vsel %vm413_vm1, %v409_v16, 0.0 }
  0x21   : > { %v485_v21 = vcombine.low %v472_v15, %v479_v17  ;;  %v415_v22 = vrot.slane %v414_v20, 4 }
  0x22   : > { %v421_v23 = vsel %vm413_vm1, %v410_v19, 0.0 }
  0x23   : > { %v487_v24 = vadd.f32 %v485_v21, %v473_v18  ;;  %v416_v25 = vadd.f32 %v415_v22, %v414_v20  ;;  %v422_v26 = vrot.slane %v421_v23, 4 }
  0x25   : > { %488 = vst [vmem:[#allocation3] sm:$0x77] %v487_v24  ;;  %v417_v27 = vrot.slane %v416_v25, 2  ;;  %v423_v28 = vadd.f32 %v422_v26, %v421_v23 }
  0x27   : > { %v418_v29 = vadd.f32 %v417_v27, %v416_v25  ;;  %v424_v30 = vrot.slane %v423_v28, 2 }
  0x29   : > { %v419_v31 = vrot.slane %v418_v29, 1  ;;  %v425_v32 = vadd.f32 %v424_v30, %v423_v28 }
  0x2b   : > { %v420_v33 = vadd.f32 %v419_v31, %v418_v29  ;;  %v426_v34 = vrot.slane %v425_v32, 1 }
  0x2c   : > { %v517_v58 = vld [vmem:[#allocation3] sm:$0x77] (%p378_p6) }
  0x2d   : > { %v427_v35 = vadd.f32 %v426_v34, %v425_v32  ;;  %752 = vrsqrt.f32 %v420_v33  ;;  %vm431_vm2 = vcmp.eq.f32.partialorder %v420_v33, inf  ;;  %v434_v39 = vand.u32 2147483648, %v420_v33 }
  0x2e   : > { %vm433_vm3 = vcmp.eq.f32.partialorder %v420_v33, 0.0  ;;  %v519_v62 = vcombine.high (%p378_p6), %v517_v58, %v517_v58  ;;  %v522_v2 = vsel (%p378_p6), %vm521_vm8, %v517_v58, 0.0 }
  0x2f   : > { %754 = vrsqrt.f32 %v427_v35  ;;  %vm438_vm4 = vcmp.eq.f32.partialorder %v427_v35, inf  ;;  %v441_v43 = vand.u32 2147483648, %v427_v35  ;;  %vm440_vm5 = vcmp.eq.f32.partialorder %v427_v35, 0.0 }
  0x30   : > { %757 = vlog2.f32 (%p378_p6), %v535_v59  ;;  %v523_v3 = vsel (%p378_p6), %vm521_vm8, %v519_v62, 0.0 }
  0x31   : > { %759 = vlog2.f32 (%p378_p6), %v540_v63  ;;  %v524_v5 = vadd.f32 (%p378_p6), %v523_v3, %v522_v2 }
  0x37   : > { %v753_v38 = vpop.eup %752 }
  0x38   : > { %v430_v40 = vmul.f32 %v753_v38, %v420_v33 }
  0x39   : > { %v755_v42 = vpop.eup %754 }
  0x3a   : > { %v432_v44 = vsel %vm431_vm2, %v420_v33, %v430_v40  ;;  %v437_v45 = vmul.f32 %v755_v42, %v427_v35  ;;  %v758_v6 = vpop.eup (%p378_p6), %757 }
  0x3b   : > { %v435_v46 = vsel %vm433_vm3, %v434_v39, %v432_v44  ;;  %v538_v8 = vmul.f32 (%p378_p6), 0.6931472, %v758_v6  ;;  %v760_v9 = vpop.eup (%p378_p6), %759 }
  0x3c   : > { %v439_v47 = vsel %vm438_vm4, %v427_v35, %v437_v45  ;;  %v542_v11 = vmul.f32 (%p378_p6), 0.6931472, %v760_v9 }
  0x3d   : > { %v442_v49 = vsel %vm440_vm5, %v441_v43, %v439_v47  ;;  %v539_v10 = vmax.f32 (%p378_p6), %v538_v8, -100.0 }
  0x3e   : > { %v447_v50 = vcombine.low %v435_v46, %v442_v49  ;;  %v543_v13 = vmax.f32 (%p378_p6), %v542_v11, -100.0 }
  0x3f   : > { %v544_v14 = vmul.f32 (%p378_p6), %v539_v10, %v536_v7 }
  0x40   : > { %v454_v51 = vrot.slane %v447_v50, %v453_v48  ;;  %490 = sbr.rel (!%p378_p6) target bundleno = 300 (0x12c), region = 52  ;;  %v546_v15 = vmul.f32 (%p378_p6), %v545_v12, %v543_v13 }
  0x42   : > { %v461_v53 = vrot.slane %v454_v51, %v453_v48  ;;  %v547_v16 = vadd.f32 (%p378_p6), %v546_v15, %v544_v14 }
  0x44   : > { %v463_v54 = vadd.f32 %v461_v53, %v428_v52  ;;  %v548_v17 = vsub.f32 (%p378_p6), 0.0, %v547_v16 }
  0x46   : > { %468 = vst.msk [vmem:[#allocation2] sm:$0x3] %vm466_vm6, %v463_v54  ;;  %v550_v18 = vsel (%p378_p6), %vm549_vm9, %v548_v17, 0.0 }
  0x47   : > { %551 = vadd.xlane.f32.xlu1 %v550_v18 }
  0x4d   : > { %v491_v55 = vld [vmem:[#allocation2] sm:$0x3] }
  0x4e   : > { %v496_v60 = vrot.slane %v491_v55, %v495_v56  ;;  %v500_v61 = vrot.slane %v491_v55, %v499_v57 }
  0x50   : > { %v504_v0 = vsel %vm503_vm7, %v496_v60, 0.0  ;;  %v505_v1 = vsel %vm503_vm7, %v500_v61, 0.0 }
  0x51   : > { %v506_v4 = vadd.f32 %v505_v1, %v504_v0 }
  0x53   : > { %507 = vadd.xlane.f32.xlu0 %v506_v4 }
  0x57   : > { %525 = vadd.xlane.f32.xlu0 %v524_v5 }
  0xd4   : > { %v552_v33 = vpop.xlane.xlu1 %551 }
  0xd5   : > { %v553_v34 = vrot.slane %v552_v33, 4 }
  0xd7   : > { %v554_v35 = vadd.f32 %v553_v34, %v552_v33 }
  0xd9   : > { %v555_v36 = vrot.slane %v554_v35, 2 }
  0xdb   : > { %v556_v37 = vadd.f32 %v555_v36, %v554_v35 }
  0xdd   : > { %v557_v38 = vrot.slane %v556_v37, 1 }
  0xdf   : > { %v558_v39 = vadd.f32 %v557_v38, %v556_v37 }
  0xe0   : > { %v508_v19 = vpop.xlane.xlu0 %507 }
  0xe1   : > { %v509_v20 = vrot.slane %v508_v19, 4 }
  0xe3   : > { %v510_v21 = vadd.f32 %v509_v20, %v508_v19 }
  0xe4   : > { %v526_v22 = vpop.xlane.xlu0 %525 }
  0xe5   : > { %v511_v23 = vrot.slane %v510_v21, 2  ;;  %v527_v24 = vrot.slane %v526_v22, 4 }
  0xe7   : > { %v528_v25 = vadd.f32 %v527_v24, %v526_v22  ;;  %v512_v26 = vadd.f32 %v511_v23, %v510_v21 }
  0xe9   : > { %v529_v27 = vrot.slane %v528_v25, 2  ;;  %v513_v28 = vrot.slane %v512_v26, 1 }
  0xeb   : > { %v530_v29 = vadd.f32 %v529_v27, %v528_v25  ;;  %v514_v30 = vadd.f32 %v513_v28, %v512_v26 }
  0xed   : > { %712 = vpush %v514_v30  ;;  %v531_v31 = vrot.slane %v530_v29, 1 }
  0xef   : > { %v532_v32 = vadd.f32 %v531_v31, %v530_v29 }
  0xf1   : > { %714 = vpush %v532_v32 }
  0xf2   : > { %716 = vpush %v558_v39 }
 0x11e   : > { %s713_s21 = spop %712 }
 0x11f   : > { %s516_s26 = smul.f32 0.001953125, %s713_s21 }
 0x121   : > { %569 = sst [smem:[#allocation4 + $0x1]] %s516_s26  ;;  %s561_s29 = smul.f32 0.1, %s516_s26 }
 0x122   : > { %s715_s27 = spop %714 }
 0x123   : > { %s534_s28 = smul.f32 0.0006510417, %s715_s27  ;;  %s717_s7 = spop %716 }
 0x124   : > { %s560_s8 = smul.f32 0.5, %s717_s7 }
 0x125   : > { %571 = sst [smem:[#allocation4 + $0x2]] %s534_s28  ;;  %s562_s30 = smul.f32 0.01, %s534_s28 }
 0x126   : > { %s564_s10 = smul.f32 0.1, %s560_s8  ;;  %573 = sst [smem:[#allocation4 + $0x3]] %s560_s8 }
 0x127   : > { %s563_s9 = sadd.f32 %s562_s30, %s561_s29 }
 0x129   : > { %s565_s11 = sadd.f32 %s564_s10, %s563_s9 }
 0x12b   : > { %567 = sst [smem:[#allocation4]] %s565_s11 }
 0x12c PF: > { %p722_p7 = scmp.eq.s32.totalorder %s688_s24, 1  ;;  %s761_s14 = scalar_lea.hbm %s920_s6, 16 }
 0x12d   : > { %p762_p8 = scmp.ne.s32.totalorder %s920_s6, %s761_s14  ;;  %p767_p11 = scmp.lt.u32.totalorder %s761_s14, %s920_s6 }
 0x12f   : > { %p763_p9 = pnand %p762_p8, %p722_p7 }
 0x131   : > { %p764_p10 = pneg %p763_p9 }
 0x133   : > { %p769_p12 = pnand %p767_p11, %p764_p10 }
 0x135   : > { %772 = shalt.err (!%p769_p12)
}
 0x136   : > { %s804_s19 = smov [#allocation4]  }
 0x137   : > { %719 = dma.smem_to_hbm (%p722_p7), %s804_s19, 16, %s920_s6, [#allocation5]  }
 0x138   : > { %786 = dma.done.wait (%p722_p7), [#allocation5], 16  }
 0x139   : > { %788 = vsyncadd (%p722_p7), [#allocation5], 4294967280 }
 0x13a   : > { %587 = sfence }
 0x13b PF: > { %s17_s23 = sadd.s32 1, %s799_s23   ;;  %s921_s21 = smov %s795_s22 }
 0x13c   : > { %p14_p13 = scmp.ge.s32.totalorder %s17_s23, 4   ;;  %s922_s22 = smov %s924_s25 }
 0x13e   :  { %16 = sbr.rel (!%p14_p13) target bundleno = 2 (0x2), region = 92 }
 0x145   :  { %593 = vsyncpa [#allocation5], 1 }
 0x146   :  { %595 = vsyncpa [#allocation5 + $0x1], 1 }

</bundles_post_ra>
